<compile_context>
chip_gen: v5e
topology: v5e:2x2
jax: 0.10.0
libtpu: 0.0.40
codegen_flags: <defaults>
</compile_context>

<pallas_src>
import jax
import jax.numpy as jnp
from jax import lax
from jax.experimental import pallas as pl
from jax.experimental.pallas import tpu as pltpu


# ----------------------------------------------------------------------------------------------
# Path 1: table resident in VMEM, gather via a single batched one-hot matmul on the MXU.
# ----------------------------------------------------------------------------------------------
def _clip_embedding_onehot_kernel(tok_ref, table_ref, pos_ref, o_ref):
    # tok_ref  : VMEM (block_b, T, 1) int32
    # table_ref: VMEM (V, E)            (resident; constant index_map)
    # pos_ref  : VMEM (T, E)            (resident; constant index_map)
    # o_ref    : VMEM (block_b, T, E)
    block_b, T, E = o_ref.shape
    V = table_ref.shape[0]
    M = block_b * T

    # NOTE: out-of-range ids are clamped (PyTorch would error); keeps dynamic reads in bounds.
    toks = jnp.clip(tok_ref[...].reshape(M, 1), 0, V - 1)            # (M, 1) int32
    col = lax.broadcasted_iota(jnp.int32, (M, V), 1)                 # (M, V) vocab-index grid
    one_hot = (toks == col).astype(table_ref.dtype)                  # (M, V), exact 0/1

    # One batched matmul for the whole block: fills the MXU (M = block_b*T rows) instead of
    # block_b separate T-row matmuls; one-hot selection is exact with f32 accumulation.
    rows = jnp.dot(one_hot, table_ref[...],
                   preferred_element_type=jnp.float32)               # (M, E) f32

    pos = pos_ref[...].astype(jnp.float32)                           # (T, E), hoisted
    out = rows.reshape(block_b, T, E) + pos[None, :, :]
    o_ref[...] = out.astype(o_ref.dtype)                             # single lane-dense store


# ----------------------------------------------------------------------------------------------
# Path 2: table stays in HBM; rows gathered by overlapped DMAs straight into the output block.
# ----------------------------------------------------------------------------------------------
def _clip_embedding_dma_kernel(tokens_smem, table_hbm, pos_ref, o_ref, sems):
    # tokens_smem: SMEM (B*T,) int32   (scalar prefetch, flattened)
    # table_hbm  : HBM  (V, E)         (memory_space=pl.ANY; never copied wholesale to VMEM)
    # pos_ref    : VMEM (T, E)
    # o_ref      : VMEM (block_b, T, E)  (DMA destination AND output block — no scratch slab)
    # sems       : DMA semaphores (block_b,)  — one per batch row, shared by its T row DMAs
    block_b, T, E = o_ref.shape
    V = table_hbm.shape[0]
    base = pl.program_id(0) * (block_b * T)                          # flat token offset

    # Issue ALL block_b*T row-gather DMAs up front so their HBM latencies overlap.
    for b in range(block_b):                                         # static, small
        def issue(t, carry, b=b):
            tok = jnp.clip(tokens_smem[base + b * T + t], 0, V - 1)  # bounds-safe row index
            pltpu.make_async_copy(
                table_hbm.at[pl.ds(tok, 1), :],                      # (1, E) HBM row
                o_ref.at[b, pl.ds(t, 1), :],                         # (1, E) slice of output
                sems.at[b],
            ).start()
            return carry
        lax.fori_loop(0, T, issue, 0, unroll=8)                      # capped unroll

    pos = pos_ref[...]
    # Interleave waits with compute: wait only batch row b's T DMAs, then do that row's
    # positional add + full (T, E) slab store while the other rows' DMAs stay in flight.
    for b in range(block_b):
        def wait(t, carry, b=b):
            pltpu.make_async_copy(
                table_hbm.at[pl.ds(0, 1), :],                        # shape-only descriptor:
                o_ref.at[b, pl.ds(0, 1), :],                         # must match issue shape
                sems.at[b],
            ).wait()
            return carry
        lax.fori_loop(0, T, wait, 0, unroll=8)
        o_ref[b] = (o_ref[b] + pos).astype(o_ref.dtype)              # lane-dense (T, E) store


# ----------------------------------------------------------------------------------------------
# Wrapper
# ----------------------------------------------------------------------------------------------
def _divisors(n):
    return [d for d in range(1, n + 1) if n % d == 0]


def _tpu_vmem_capacity_bytes():
    try:
        return int(pltpu.get_tpu_info().vmem_capacity_bytes)
    except Exception:
        return 64 * 1024 * 1024          # conservative (v7x-sized) fallback


def _looks_like_v7x():
    try:
        kind = jax.devices()[0].device_kind.lower()
        return ("v7" in kind) or ("7x" in kind)
    except Exception:
        return False


def clip_embedding(tokens, table, pos_emb, *, block_b=None, force_hbm_table=False,
                   onehot_vocab_limit=4096, vmem_budget_bytes=None):
    """tokens: (B, T) int, table: (V, E), pos_emb: (T, E) -> (B, T, E) in table.dtype."""
    B, T = tokens.shape
    V, E = table.shape
    assert pos_emb.shape == (T, E)
    tokens = tokens.astype(jnp.int32)
    out_dtype = table.dtype                                 # matches PyTorch's in-place `x += pos`
    itemsize = jnp.dtype(table.dtype).itemsize

    vmem_cap = _tpu_vmem_capacity_bytes()
    is_v7x = _looks_like_v7x()
    if vmem_budget_bytes is None:
        # Generation-aware resident-footprint budget: v5e/v6e have 128 MiB physical VMEM,
        # v7x only 64 MiB; leave headroom for compiler scratch + pipeline buffers.
        vmem_budget_bytes = min(48 * 1024 * 1024, vmem_cap // 2)

    divisors = _divisors(B)

    def onehot_footprint(bb):
        m = bb * T
        return (2 * V * E * itemsize              # table (conservatively double-buffered)
                + m * V * itemsize                # batched one-hot temporary
                + m * E * 4                       # f32 matmul result
                + 2 * bb * T * E * itemsize       # output block (double-buffered)
                + 2 * T * E * itemsize            # positional table
                + 2 * bb * T * 4)                 # token block

    # ---- path decision -------------------------------------------------------------
    # Gate on V (MXU FLOP cost 2*M*V*E), not just table bytes; skip f32 MXU on v7x.
    use_onehot = (not force_hbm_table) and (V <= onehot_vocab_limit)
    if is_v7x and table.dtype == jnp.float32:
        use_onehot = False                        # f32 matmul is emulated (bf16 passes) on v7x
    if use_onehot and onehot_footprint(1) > vmem_budget_bytes:
        use_onehot = False

    if use_onehot:
        if block_b is None:
            # Smallest divisor with block_b*T >= 256 (fill the v6e/v7x MXU rows); shrink
            # while the resident footprint exceeds the budget.
            cand = [d for d in divisors if d * T >= 256]
            bb = cand[0] if cand else B
            while onehot_footprint(bb) > vmem_budget_bytes:
                smaller = [d for d in divisors if d < bb]
                if not smaller:
                    break
                bb = smaller[-1]
            if is_v7x and bb == B and B >= 2:
                bb = [d for d in divisors if d < B][-1]   # keep >= 2 steps for the 2-TC split
            block_b = bb
        assert B % block_b == 0, "block_b must divide the batch"
        grid = (B // block_b,)
        vmem_limit = min(vmem_cap * 3 // 4,
                         max(32 * 1024 * 1024,
                             onehot_footprint(block_b) + 16 * 1024 * 1024))
        grid_spec = pltpu.PrefetchScalarGridSpec(
            num_scalar_prefetch=0,
            grid=grid,
            in_specs=[
                pl.BlockSpec((block_b, T, 1), lambda i: (i, 0, 0)),   # token ids for this block
                pl.BlockSpec((V, E), lambda i: (0, 0)),               # full table, VMEM resident
                pl.BlockSpec((T, E), lambda i: (0, 0)),               # positional table, resident
            ],
            out_specs=pl.BlockSpec((block_b, T, E), lambda i: (i, 0, 0)),
        )
        return pl.pallas_call(
            _clip_embedding_onehot_kernel,
            out_shape=jax.ShapeDtypeStruct((B, T, E), out_dtype),
            grid_spec=grid_spec,
            compiler_params=pltpu.CompilerParams(
                dimension_semantics=("parallel",),
                vmem_limit_bytes=vmem_limit),
        )(tokens.reshape(B, T, 1), table, pos_emb)

    # ---- HBM-resident table; gather rows by DMA directly into the output block -------
    if block_b is None:
        row_bytes = T * E * itemsize
        target = 2 * 1024 * 1024                          # ~2 MiB of output per grid step
        cap_rows = max(1, target // max(row_bytes, 1))
        bb = max(d for d in divisors if d <= min(cap_rows, 16))   # cap static per-row loops
        if is_v7x and bb == B and B >= 2:
            bb = max(d for d in divisors if d < B)        # >= 2 steps for the 2-TC split
        block_b = bb
    assert B % block_b == 0, "block_b must divide the batch"
    grid = (B // block_b,)
    dma_footprint = 2 * block_b * T * E * itemsize + 2 * T * E * itemsize
    vmem_limit = min(vmem_cap * 3 // 4,
                     max(32 * 1024 * 1024, dma_footprint + 16 * 1024 * 1024))
    grid_spec = pltpu.PrefetchScalarGridSpec(
        num_scalar_prefetch=1,
        grid=grid,
        in_specs=[
            pl.BlockSpec(memory_space=pl.ANY),                        # table stays in HBM
            pl.BlockSpec((T, E), lambda i, tok: (0, 0)),              # positional table, resident
        ],
        out_specs=pl.BlockSpec((block_b, T, E), lambda i, tok: (i, 0, 0)),
        scratch_shapes=[
            pltpu.SemaphoreType.DMA((block_b,)),                      # one sem per batch row
        ],
    )
    return pl.pallas_call(
        _clip_embedding_dma_kernel,
        out_shape=jax.ShapeDtypeStruct((B, T, E), out_dtype),
        grid_spec=grid_spec,
        compiler_params=pltpu.CompilerParams(
            dimension_semantics=("parallel",),
            vmem_limit_bytes=vmem_limit),
    )(tokens.reshape(-1), table, pos_emb)


if __name__ == "__main__":
    # Small shapes consistent with CLIP_Embedding(vocab_dim, embed_dim, n_tokens)
    vocab_dim, embed_dim, n_tokens, batch = 256, 128, 8, 2

    key = jax.random.PRNGKey(0)
    k_tab, k_pos, k_tok = jax.random.split(key, 3)

    # nn.Embedding weight ~ N(0, 1); position_embedding is zeros in __init__, but use a small
    # deterministic random init here so the add path is actually exercised.
    token_embedding = jax.random.normal(k_tab, (vocab_dim, embed_dim), dtype=jnp.float32)
    position_embedding = 0.02 * jax.random.normal(k_pos, (n_tokens, embed_dim), dtype=jnp.float32)
    tokens = jax.random.randint(k_tok, (batch, n_tokens), 0, vocab_dim, dtype=jnp.int32)

    # Pure-JAX reference: x = Embedding(tokens); x += position_embedding
    ref = jnp.take(token_embedding, tokens, axis=0) + position_embedding[None, :, :]

    # Default path (one-hot MXU on v5e/v6e; DMA gather for f32 tables on v7x).
    out_default = jax.block_until_ready(
        clip_embedding(tokens, token_embedding, position_embedding))
    # Force the scalable HBM-table DMA-gather path so it is always validated too.
    out_hbm = jax.block_until_ready(
        clip_embedding(tokens, token_embedding, position_embedding, force_hbm_table=True))

    for out in (out_default, out_hbm):
        assert out.shape == (batch, n_tokens, embed_dim)
        assert out.dtype == jnp.float32
        assert jnp.allclose(out, ref, atol=1e-6, rtol=1e-6), "mismatch vs reference"

    print("KERNEL_OK")
</pallas_src>

<mosaic_0001>
module attributes {stable_mosaic.version = 11 : i64} {
  func.func @_clip_embedding_onehot_kernel(%arg0: i32, %arg1: memref<2x8x1xi32, #tpu.memory_space<vmem>>, %arg2: memref<256x128xf32, #tpu.memory_space<vmem>>, %arg3: memref<8x128xf32, #tpu.memory_space<vmem>>, %arg4: memref<2x8x128xf32, #tpu.memory_space<vmem>>) attributes {dimension_semantics = [#tpu.dimension_semantics<parallel>], iteration_bounds = array<i64: 1>, scalar_prefetch = 0 : i64, scratch_operands = 0 : i64, tpu.core_type = #tpu.core_type<tc>, window_params = [{transform_indices = @transform_0, window_bounds = array<i64: 2, 8, 1>}, {pipeline_mode = #tpu.pipeline_mode<synchronous>, transform_indices = @transform_1, window_bounds = array<i64: 256, 128>}, {pipeline_mode = #tpu.pipeline_mode<synchronous>, transform_indices = @transform_2, window_bounds = array<i64: 8, 128>}, {transform_indices = @transform_3, window_bounds = array<i64: 2, 8, 128>}]} {
    %c0 = arith.constant 0 : index
    %c0_0 = arith.constant 0 : index
    %c0_1 = arith.constant 0 : index
    %0 = vector.load %arg1[%c0, %c0_0, %c0_1] : memref<2x8x1xi32, #tpu.memory_space<vmem>>, vector<2x8x1xi32>
    %1 = vector.shape_cast %0 : vector<2x8x1xi32> to vector<16x1xi32>
    %c0_i32 = arith.constant 0 : i32
    %c255_i32 = arith.constant 255 : i32
    %2 = vector.broadcast %c0_i32 : i32 to vector<16x1xi32>
    %3 = arith.maxsi %2, %1 : vector<16x1xi32>
    %4 = vector.broadcast %c255_i32 : i32 to vector<16x1xi32>
    %5 = arith.minsi %4, %3 : vector<16x1xi32>
    %6 = tpu.iota {dimensions = array<i32: 1>} : vector<16x256xi32>
    %7 = vector.broadcast %5 : vector<16x1xi32> to vector<16x256xi32>
    %8 = arith.cmpi eq, %7, %6 : vector<16x256xi32>
    %9 = arith.extui %8 : vector<16x256xi1> to vector<16x256xi32>
    %10 = arith.sitofp %9 : vector<16x256xi32> to vector<16x256xf32>
    %c0_2 = arith.constant 0 : index
    %c0_3 = arith.constant 0 : index
    %11 = vector.load %arg2[%c0_2, %c0_3] : memref<256x128xf32, #tpu.memory_space<vmem>>, vector<256x128xf32>
    %cst = arith.constant dense<0.000000e+00> : vector<16x128xf32>
    %12 = tpu.matmul %10, %11, %cst {dimension_numbers = #tpu.dot_dimension_numbers<[1], [0], [0], [1], [0, 0, 1, 1], [], []>} : vector<16x256xf32>, vector<256x128xf32>, vector<16x128xf32> -> vector<16x128xf32>
    %c0_4 = arith.constant 0 : index
    %c0_5 = arith.constant 0 : index
    %13 = vector.load %arg3[%c0_4, %c0_5] : memref<8x128xf32, #tpu.memory_space<vmem>>, vector<8x128xf32>
    %14 = vector.shape_cast %12 : vector<16x128xf32> to vector<2x8x128xf32>
    %15 = vector.shape_cast %13 : vector<8x128xf32> to vector<1x8x128xf32>
    %16 = vector.broadcast %15 : vector<1x8x128xf32> to vector<2x8x128xf32>
    %17 = arith.addf %14, %16 : vector<2x8x128xf32>
    %c0_6 = arith.constant 0 : index
    %c0_7 = arith.constant 0 : index
    %c0_8 = arith.constant 0 : index
    %18 = vector.load %arg4[%c0_6, %c0_7, %c0_8] : memref<2x8x128xf32, #tpu.memory_space<vmem>>, vector<2x8x128xf32>
    tpu.vector_store %arg4[%c0_6, %c0_7, %c0_8], %17 {strides = array<i32>} : memref<2x8x128xf32, #tpu.memory_space<vmem>>, vector<2x8x128xf32>,
    return
  }
  func.func @transform_0(%arg0: i32) -> (i32, i32, i32) {
    %c0_i32 = arith.constant 0 : i32
    %c0_i32_0 = arith.constant 0 : i32
    %c0_i32_1 = arith.constant 0 : i32
    return %arg0, %c0_i32, %c0_i32_0 : i32, i32, i32
  }
  func.func @transform_1(%arg0: i32) -> (i32, i32) {
    %c0_i32 = arith.constant 0 : i32
    %c0_i32_0 = arith.constant 0 : i32
    %c0_i32_1 = arith.constant 0 : i32
    return %c0_i32, %c0_i32_0 : i32, i32
  }
  func.func @transform_2(%arg0: i32) -> (i32, i32) {
    %c0_i32 = arith.constant 0 : i32
    %c0_i32_0 = arith.constant 0 : i32
    %c0_i32_1 = arith.constant 0 : i32
    return %c0_i32, %c0_i32_0 : i32, i32
  }
  func.func @transform_3(%arg0: i32) -> (i32, i32, i32) {
    %c0_i32 = arith.constant 0 : i32
    %c0_i32_0 = arith.constant 0 : i32
    %c0_i32_1 = arith.constant 0 : i32
    return %arg0, %c0_i32, %c0_i32_0 : i32, i32, i32
  }
}

</mosaic_0001>

<bundles_post_ra>
// kernel: tpu_custom_call.1
= control target key start
LH: loop header
LB: loop body
LE: loop exit
PB: predicated region body
PF: predicated region fallthrough
CT: control target
= control target key end

     0   :  { %8 = vsyncpa [#allocation3], 0  ;;  %s310_s0 = inlined_call_operand.vmem [shape: s32[2,8,1], index: 0, kind: input, shape index: {}]   ;;  %s311_s1 = inlined_call_operand.hbm [shape: f32[256,128], index: 1, kind: input, shape index: {}]   ;;  %s312_s2 = inlined_call_operand.vmem [shape: f32[8,128], index: 2, kind: input, shape index: {}]   ;;  %s313_s3 = inlined_call_operand.hbm [shape: f32[2,8,128], index: 3, kind: output, shape index: {}]  }
   0x1   :  { %9 = vsyncpa [#allocation4], 0  ;;  %s16_s14 = sshll.u32 %s311_s1, 4  ;;  %s263_s15 = smov [#allocation2]   ;;  %s17_s14 = int_to_ptr.hbm [resolvable:$true] %s16_s14 }
   0x2   :  { %s18_s16 = sshll.u32 %s263_s15, 4  ;;  %s264_s17 = smov 128   ;;  %s19_s16 = int_to_ptr.vmem [resolvable:$true] %s18_s16 }
   0x3   :  { %s265_s18 = smov 8  }
   0x4   :  { %24 = dma.hbm_to_vmem [thread:$0]  %s17_s14, 4096, %s19_s16, [#allocation3], %s264_s17, %s264_s17, %s265_s18  }
   0x5   :  { %259 = dma.done.wait [#allocation3], 4096  }
   0x6   :  { %260 = vsyncadd [#allocation3], 4294963200  ;;  %v266_v0 = vmov 0   ;;  %v32_v1 = vld [vmem:[%s310_s0 + $0x8] sm:$0xff]  ;;  %v31_v2 = vld [vmem:[%s310_s0] sm:$0xff]  ;;  %v41_v39 = vlaneseq  ;;  %v267_v43 = vmov 1.0  }
   0x7   :  { %210 = vset.pattern.permute.xlu0 %v266_v0  ;;  %v77_v3 = vld [vmem:[#allocation2 + $0x78] sm:$0xff]  ;;  %vm35_vm0 = vcmp.gt.s32.totalorder %v32_v1, 0  ;;  %vm33_vm1 = vcmp.gt.s32.totalorder %v31_v2, 0  ;;  %v76_v5 = vld [vmem:[#allocation2 + $0x70] sm:$0xff]  ;;  %v75_v8 = vld [vmem:[#allocation2 + $0x68] sm:$0xff]  ;;  %s268_s23 = smov [#allocation5]  }
   0x8   :  { %172 = vmatpush.msra.mxu2 %v77_v3  ;;  %v93_v4 = vld [vmem:[#allocation2 + $0xf8] sm:$0xff]  ;;  %v92_v6 = vld [vmem:[#allocation2 + $0xf0] sm:$0xff]  ;;  %94 = vmatpush.msra.mxu0 %v77_v3  ;;  %v36_v7 = vsel %vm35_vm0, %v32_v1, 0  ;;  %v91_v9 = vld [vmem:[#allocation2 + $0xe8] sm:$0xff]  ;;  %v34_v11 = vsel %vm33_vm1, %v31_v2, 0  ;;  %v42_v40 = vand.u32 127, %v41_v39 }
   0x9   :  { %188 = vmatpush.msra.mxu3 %v93_v4  ;;  %117 = vmatpush.msra.mxu1 %v93_v4  ;;  %vm39_vm2 = vcmp.lt.s32.totalorder %v36_v7, 255  ;;  %v74_v12 = vld [vmem:[#allocation2 + $0x60] sm:$0xff]  ;;  %v73_v14 = vld [vmem:[#allocation2 + $0x58] sm:$0xff]  ;;  %vm37_vm3 = vcmp.lt.s32.totalorder %v34_v11, 255  ;;  %v72_v16 = vld [vmem:[#allocation2 + $0x50] sm:$0xff]  ;;  %s149_s24 = sshll.u32 %s268_s23, 4  ;;  %s150_s24 = int_to_ptr.vmem [resolvable:$true] %s149_s24 }
   0xa   :  { %173 = vmatpush.msra.mxu2 %v76_v5  ;;  %95 = vmatpush.msra.mxu0 %v76_v5  ;;  %v40_v10 = vsel %vm39_vm2, %v36_v7, 255  ;;  %v90_v13 = vld [vmem:[#allocation2 + $0xe0] sm:$0xff]  ;;  %v89_v15 = vld [vmem:[#allocation2 + $0xd8] sm:$0xff]  ;;  %v88_v17 = vld [vmem:[#allocation2 + $0xd0] sm:$0xff]  ;;  %v38_v18 = vsel %vm37_vm3, %v34_v11, 255  ;;  %v43_v41 = vadd.s32 128, %v42_v40 }
   0xb   :  { %189 = vmatpush.msra.mxu3 %v92_v6  ;;  %118 = vmatpush.msra.mxu1 %v92_v6  ;;  %v71_v19 = vld [vmem:[#allocation2 + $0x48] sm:$0xff]  ;;  %v70_v21 = vld [vmem:[#allocation2 + $0x40] sm:$0xff]  ;;  %v69_v23 = vld [vmem:[#allocation2 + $0x38] sm:$0xff]  ;;  %s151_s27 = sshll.u32 %s313_s3, 4  ;;  %s152_s27 = int_to_ptr.hbm [resolvable:$true] %s151_s27 }
   0xc   :  { %48 = vperm.xlu0 %210, %v40_v10   ;;  %174 = vmatpush.msra.mxu2 %v75_v8  ;;  %v87_v20 = vld [vmem:[#allocation2 + $0xc8] sm:$0xff]  ;;  %v86_v22 = vld [vmem:[#allocation2 + $0xc0] sm:$0xff]  ;;  %v85_v24 = vld [vmem:[#allocation2 + $0xb8] sm:$0xff] }
   0xd   :  { %190 = vmatpush.msra.mxu3 %v91_v9  ;;  %96 = vmatpush.msra.mxu0 %v75_v8  ;;  %v68_v25 = vld [vmem:[#allocation2 + $0x30] sm:$0xff]  ;;  %v67_v27 = vld [vmem:[#allocation2 + $0x28] sm:$0xff]  ;;  %v66_v29 = vld [vmem:[#allocation2 + $0x20] sm:$0xff] }
   0xe   :  { %175 = vmatpush.msra.mxu2 %v74_v12  ;;  %119 = vmatpush.msra.mxu1 %v91_v9  ;;  %v84_v26 = vld [vmem:[#allocation2 + $0xb0] sm:$0xff]  ;;  %v83_v28 = vld [vmem:[#allocation2 + $0xa8] sm:$0xff]  ;;  %v82_v30 = vld [vmem:[#allocation2 + $0xa0] sm:$0xff] }
   0xf   :  { %191 = vmatpush.msra.mxu3 %v90_v13  ;;  %97 = vmatpush.msra.mxu0 %v74_v12  ;;  %v65_v31 = vld [vmem:[#allocation2 + $0x18] sm:$0xff]  ;;  %v64_v33 = vld [vmem:[#allocation2 + $0x10] sm:$0xff]  ;;  %v63_v35 = vld [vmem:[#allocation2 + $0x8] sm:$0xff] }
  0x10   :  { %176 = vmatpush.msra.mxu2 %v73_v14  ;;  %120 = vmatpush.msra.mxu1 %v90_v13  ;;  %v81_v32 = vld [vmem:[#allocation2 + $0x98] sm:$0xff]  ;;  %v80_v34 = vld [vmem:[#allocation2 + $0x90] sm:$0xff]  ;;  %v79_v36 = vld [vmem:[#allocation2 + $0x88] sm:$0xff] }
  0x11   :  { %192 = vmatpush.msra.mxu3 %v89_v15  ;;  %98 = vmatpush.msra.mxu0 %v73_v14  ;;  %v62_v37 = vld [vmem:[#allocation2] sm:$0xff] }
  0x12   :  { %177 = vmatpush.msra.mxu2 %v72_v16  ;;  %121 = vmatpush.msra.mxu1 %v89_v15  ;;  %v78_v38 = vld [vmem:[#allocation2 + $0x80] sm:$0xff] }
  0x13   :  { %193 = vmatpush.msra.mxu3 %v88_v17  ;;  %99 = vmatpush.msra.mxu0 %v72_v16  ;;  %v140_v47 = vld [vmem:[%s312_s2] sm:$0xff] }
  0x14   :  { %45 = vperm.xlu0 %210, %v38_v18   ;;  %178 = vmatpush.msra.mxu2 %v71_v19 }
  0x15   :  { %194 = vmatpush.msra.mxu3 %v87_v20  ;;  %122 = vmatpush.msra.mxu1 %v88_v17 }
  0x16   :  { %179 = vmatpush.msra.mxu2 %v70_v21  ;;  %100 = vmatpush.msra.mxu0 %v71_v19 }
  0x17   :  { %195 = vmatpush.msra.mxu3 %v86_v22  ;;  %123 = vmatpush.msra.mxu1 %v87_v20 }
  0x18   :  { %180 = vmatpush.msra.mxu2 %v69_v23  ;;  %101 = vmatpush.msra.mxu0 %v70_v21 }
  0x19   :  { %196 = vmatpush.msra.mxu3 %v85_v24  ;;  %124 = vmatpush.msra.mxu1 %v86_v22 }
  0x1a   :  { %181 = vmatpush.msra.mxu2 %v68_v25  ;;  %102 = vmatpush.msra.mxu0 %v69_v23 }
  0x1b   :  { %197 = vmatpush.msra.mxu3 %v84_v26  ;;  %125 = vmatpush.msra.mxu1 %v85_v24 }
  0x1c   :  { %182 = vmatpush.msra.mxu2 %v67_v27  ;;  %103 = vmatpush.msra.mxu0 %v68_v25 }
  0x1d   :  { %198 = vmatpush.msra.mxu3 %v83_v28  ;;  %126 = vmatpush.msra.mxu1 %v84_v26 }
  0x1e   :  { %183 = vmatpush.msra.mxu2 %v66_v29  ;;  %104 = vmatpush.msra.mxu0 %v67_v27 }
  0x1f   :  { %199 = vmatpush.msra.mxu3 %v82_v30  ;;  %127 = vmatpush.msra.mxu1 %v83_v28 }
  0x20   :  { %184 = vmatpush.msra.mxu2 %v65_v31  ;;  %105 = vmatpush.msra.mxu0 %v66_v29 }
  0x21   :  { %200 = vmatpush.msra.mxu3 %v81_v32  ;;  %128 = vmatpush.msra.mxu1 %v82_v30 }
  0x22   :  { %185 = vmatpush.msra.mxu2 %v64_v33  ;;  %106 = vmatpush.msra.mxu0 %v65_v31 }
  0x23   :  { %201 = vmatpush.msra.mxu3 %v80_v34  ;;  %129 = vmatpush.msra.mxu1 %v81_v32 }
  0x24   :  { %186 = vmatpush.msra.mxu2 %v63_v35  ;;  %107 = vmatpush.msra.mxu0 %v64_v33 }
  0x25   :  { %202 = vmatpush.msra.mxu3 %v79_v36  ;;  %130 = vmatpush.msra.mxu1 %v80_v34 }
  0x26   :  { %108 = vmatpush.msra.mxu0 %v63_v35  ;;  %187 = vmatpush.msra.mxu2 %v62_v37 }
  0x27   :  { %131 = vmatpush.msra.mxu1 %v79_v36  ;;  %203 = vmatpush.msra.mxu3 %v78_v38 }
  0x28   :  { %109 = vmatpush.msra.mxu0 %v62_v37 }
  0x29   :  { %132 = vmatpush.msra.mxu1 %v78_v38 }
  0x7e   :  { %v49_v42 = vpop.permute.xlu0 %48 }
  0x7f   :  { %vm52_vm4 = vcmp.eq.s32.totalorder %v49_v42, %v42_v40  ;;  %vm53_vm5 = vcmp.eq.s32.totalorder %v49_v42, %v43_v41 }
  0x80   :  { %169 = vmatmul.msk.f32.vlgmr.msra.gmra.mxu2 %vm52_vm4, %v267_v43  ;;  %171 = vmatmul.msk.f32.vlgmr.msra.gmra.mxu3 %vm53_vm5, %v267_v43 }
  0x86   :  { %v46_v44 = vpop.permute.xlu0 %45 }
  0x87   :  { %vm50_vm6 = vcmp.eq.s32.totalorder %v46_v44, %v42_v40  ;;  %vm51_vm7 = vcmp.eq.s32.totalorder %v46_v44, %v43_v41 }
  0x88   :  { %168 = vmatmul.msk.f32.vlgmr.msra.gmra.mxu0 %vm50_vm6, %v267_v43  ;;  %170 = vmatmul.msk.f32.vlgmr.msra.gmra.mxu1 %vm51_vm7, %v267_v43 }
 0x103   :  { %v114_v45 = vpop.f32.mrf.mxu2  ;;  %v137_v46 = vpop.f32.mrf.mxu3 }
 0x104   :  { %v138_v48 = vadd.f32 %v137_v46, %v114_v45 }
 0x105   :  { %v111_v49 = vpop.f32.mrf.mxu0  ;;  %v134_v50 = vpop.f32.mrf.mxu1 }
 0x106   :  { %v142_v51 = vadd.f32 %v140_v47, %v138_v48  ;;  %v135_v52 = vadd.f32 %v134_v50, %v111_v49 }
 0x108   :  { %144 = vst [vmem:[#allocation5 + $0x8] sm:$0xff] %v142_v51  ;;  %v141_v53 = vadd.f32 %v140_v47, %v135_v52 }
 0x10a   :  { %143 = vst [vmem:[#allocation5] sm:$0xff] %v141_v53 }
 0x10b   :  { %157 = dma.vmem_to_hbm [thread:$0]  %s150_s24, 256, %s152_s27, [#allocation4], %s264_s17, %s264_s17, %s265_s18  }
 0x10c   :  { %261 = dma.done.wait [#allocation4], 256  }
 0x10d   :  { %262 = vsyncadd [#allocation4], 4294967040 }
 0x10e   :  { %162 = vsyncpa [#allocation3], 1 }
 0x10f   :  { %163 = vsyncpa [#allocation4], 1 }

</bundles_post_ra>
